<compile_context>
chip_gen: v6e
topology: v6e:2x2x1
jax: 0.10.0
libtpu: 0.0.40
codegen_flags: <defaults>
</compile_context>

<pallas_src>
import functools
import math

import jax
import jax.numpy as jnp
from jax.experimental import pallas as pl
from jax.experimental.pallas import tpu as pltpu

_LN2 = math.log(2.0)
_LANES = 128
_SUBLANES = 8


def _log_cosh_f32(diff):
    # log(cosh(d)) = |d| + log1p(exp(-2|d|)) - log 2   (softplus arg is always <= 0)
    a = jnp.abs(diff.astype(jnp.float32))
    return a + jnp.log1p(jnp.exp(-2.0 * a)) - _LN2


def _logcosh_sum_kernel(p_ref, t_ref, out_ref, *,
                        block_rows, blocks_per_slice, n_valid, needs_mask):
    p = pl.program_id(0)          # parallel slice (megacore split on v7x)
    k = pl.program_id(1)          # reduction step within the slice

    @pl.when(k == 0)
    def _init():
        out_ref[...] = jnp.zeros_like(out_ref)

    d = p_ref[...].astype(jnp.float32) - t_ref[...].astype(jnp.float32)
    lc = _log_cosh_f32(d)

    def _accumulate(vals):
        if block_rows % _SUBLANES == 0:
            # Free row-major regroup; sum over the leading axis is pure vreg adds (VPU).
            part = vals.reshape(block_rows // _SUBLANES, _SUBLANES, _LANES).sum(axis=0)
        else:
            # Tiny single-block fallback (rows not a multiple of 8): put the sublane
            # reduce into row 0 of the (8,128) accumulator.
            s = jnp.sum(vals, axis=0, keepdims=True)                    # (1, 128)
            row = jax.lax.broadcasted_iota(jnp.int32, (_SUBLANES, _LANES), 0)
            part = jnp.where(row == 0, s, 0.0)
        out_ref[...] += part[None]

    if needs_mask:
        block_elems = block_rows * _LANES
        blk = p * blocks_per_slice + k
        rem = n_valid - blk * block_elems   # <= 0 for the clamped overflow block

        @pl.when(rem >= block_elems)
        def _interior():                    # hot path: no masking work at all
            _accumulate(lc)

        @pl.when(rem < block_elems)
        def _edge():                        # ragged last block / fully-masked overflow block
            rows = jax.lax.broadcasted_iota(jnp.int32, lc.shape, 0)
            lanes = jax.lax.broadcasted_iota(jnp.int32, lc.shape, 1)
            _accumulate(jnp.where(rows * _LANES + lanes < rem, lc, 0.0))
    else:
        _accumulate(lc)


def log_cosh_loss(y_pred, y_true):
    assert y_pred.shape == y_true.shape, "y_pred & y_true shapes must match"
    total = math.prod(y_pred.shape)
    if total == 0:
        return jnp.float32(float("nan"))    # torch.mean of an empty tensor is NaN

    p_flat = y_pred.reshape(-1)
    t_flat = y_true.reshape(-1)

    aligned = (total // _LANES) * _LANES
    tail_sum = None
    if aligned != total:
        # <128 leftover elements: plain jnp glue instead of padding/copying both tensors.
        tail_sum = jnp.sum(_log_cosh_f32(p_flat[aligned:].astype(jnp.float32)
                                         - t_flat[aligned:].astype(jnp.float32)))
    if aligned == 0:
        return tail_sum / jnp.float32(total)
    if aligned != total:
        # TODO(synk): this prefix slice may still materialize a copy when numel % 128 != 0;
        # the common aligned case is fully copy-free.
        p_flat = p_flat[:aligned]
        t_flat = t_flat[:aligned]

    rows = aligned // _LANES
    p2d = p_flat.reshape(rows, _LANES)      # free row-major reshape, lane-dense layout
    t2d = t_flat.reshape(rows, _LANES)

    itemsize = jnp.dtype(y_pred.dtype).itemsize
    # VMEM-aware block sizing: 2 inputs x 2 pipeline buffers + ~3 block-sized f32 temps,
    # using ~2/3 of the chip's VMEM (v5e/v6e 128 MiB -> ~12 MiB/input, v7x 64 MiB -> ~6 MiB).
    try:
        vmem_cap = int(pltpu.get_tpu_info().vmem_capacity_bytes)
    except Exception:
        vmem_cap = 64 * 1024 * 1024          # conservative fallback (v7x per-TensorCore)
    per_row_bytes = _LANES * (2 * 2 * itemsize + 3 * 4)
    budget = (2 * vmem_cap) // 3
    # sublane packing: 8 rows for 4-byte, 16 for 2-byte, 32 for 1-byte dtypes
    sub = max(_SUBLANES, (_SUBLANES * 4) // itemsize)
    block_rows_target = max(sub, (budget // per_row_bytes // sub) * sub)

    if rows <= block_rows_target:
        block_rows = rows                    # single block == full array dims (always legal)
    else:
        block_rows = block_rows_target

    block_elems = block_rows * _LANES
    n_blocks = pl.cdiv(rows, block_rows)
    if aligned + block_elems >= 2 ** 31:
        raise ValueError("log_cosh_loss Pallas kernel supports < 2**31 elements "
                         "(int32 element-index mask).")

    # Always split across 2 TensorCores (v7x megacore) when there is more than one block;
    # an odd block count gets one clamped overflow block that the element mask zeroes out.
    p_axis = 2 if n_blocks >= 2 else 1
    k_axis = pl.cdiv(n_blocks, p_axis)
    needs_mask = (p_axis * k_axis * block_elems) != aligned

    kernel = functools.partial(
        _logcosh_sum_kernel,
        block_rows=block_rows,
        blocks_per_slice=k_axis,
        n_valid=aligned,
        needs_mask=needs_mask,
    )

    # Clamp the block index so the overflow block (odd n_blocks, p_axis=2) never issues an
    # out-of-bounds DMA; its contribution is zeroed by the in-kernel element mask.
    in_map = lambda pi, ki, _K=k_axis, _nb=n_blocks: (jnp.minimum(pi * _K + ki, _nb - 1), 0)
    out_map = lambda pi, ki: (pi, 0, 0)

    vmem_limit = int(min(vmem_cap,
                         max(32 * 1024 * 1024,
                             block_rows * per_row_bytes + (4 << 20))))

    partials = pl.pallas_call(
        kernel,
        out_shape=jax.ShapeDtypeStruct((p_axis, _SUBLANES, _LANES), jnp.float32),
        grid_spec=pltpu.PrefetchScalarGridSpec(
            num_scalar_prefetch=0,
            grid=(p_axis, k_axis),
            in_specs=[
                pl.BlockSpec((block_rows, _LANES), in_map),
                pl.BlockSpec((block_rows, _LANES), in_map),
            ],
            out_specs=pl.BlockSpec((1, _SUBLANES, _LANES), out_map),
        ),
        compiler_params=pltpu.CompilerParams(
            dimension_semantics=("parallel", "arbitrary"),
            vmem_limit_bytes=vmem_limit,
        ),
        cost_estimate=pl.CostEstimate(
            flops=10 * aligned,
            transcendentals=2 * aligned,
            bytes_accessed=2 * aligned * itemsize + p_axis * _SUBLANES * _LANES * 4,
        ),
    )(p2d, t2d)

    # Tiny glue: fold the per-slice (8,128) partial sums, add the tail, take the mean.
    kernel_sum = jnp.sum(partials)
    if tail_sum is not None:
        kernel_sum = kernel_sum + tail_sum
    return kernel_sum / jnp.float32(total)


if __name__ == "__main__":
    key = jax.random.PRNGKey(0)
    k1, k2 = jax.random.split(key)

    shape = (2, 4, 16, 16)
    y_pred = jax.random.normal(k1, shape, dtype=jnp.float32)
    y_true = jax.random.normal(k2, shape, dtype=jnp.float32)

    out = jax.block_until_ready(log_cosh_loss(y_pred, y_true))

    # Pure-JAX reference check (original softplus formulation)
    diff = (y_pred - y_true).astype(jnp.float32)
    ref = jnp.mean(diff + jax.nn.softplus(-2.0 * diff) - math.log(2.0))
    assert jnp.allclose(out, ref, rtol=1e-5, atol=1e-6), (out, ref)

    print("KERNEL_OK")
</pallas_src>

<mosaic_0001>
module attributes {stable_mosaic.version = 11 : i64} {
  func.func @_logcosh_sum_kernel(%arg0: i32, %arg1: i32, %arg2: memref<16x128xf32, #tpu.memory_space<vmem>>, %arg3: memref<16x128xf32, #tpu.memory_space<vmem>>, %arg4: memref<1x8x128xf32, #tpu.memory_space<vmem>>) attributes {dimension_semantics = [#tpu.dimension_semantics<parallel>, #tpu.dimension_semantics<arbitrary>], iteration_bounds = array<i64: 1, 1>, scalar_prefetch = 0 : i64, scratch_operands = 0 : i64, tpu.core_type = #tpu.core_type<tc>, window_params = [{transform_indices = @transform_0, window_bounds = array<i64: 16, 128>}, {transform_indices = @transform_1, window_bounds = array<i64: 16, 128>}, {transform_indices = @transform_2, window_bounds = array<i64: 1, 8, 128>}]} {
    %c0_i32 = arith.constant 0 : i32
    %0 = arith.cmpi eq, %arg1, %c0_i32 : i32
    %1 = arith.extui %0 : i1 to i32
    %c0_i32_0 = arith.constant 0 : i32
    %2 = arith.cmpi ne, %1, %c0_i32_0 : i32
    scf.if %2 {
      %cst_12 = arith.constant 0.000000e+00 : f32
      %20 = vector.broadcast %cst_12 : f32 to vector<1x8x128xf32>
      %c0_13 = arith.constant 0 : index
      %c0_14 = arith.constant 0 : index
      %c0_15 = arith.constant 0 : index
      %21 = vector.load %arg4[%c0_13, %c0_14, %c0_15] : memref<1x8x128xf32, #tpu.memory_space<vmem>>, vector<1x8x128xf32>
      tpu.vector_store %arg4[%c0_13, %c0_14, %c0_15], %20 {strides = array<i32>} : memref<1x8x128xf32, #tpu.memory_space<vmem>>, vector<1x8x128xf32>,
    } else {
    }
    %c0 = arith.constant 0 : index
    %c0_1 = arith.constant 0 : index
    %3 = vector.load %arg2[%c0, %c0_1] : memref<16x128xf32, #tpu.memory_space<vmem>>, vector<16x128xf32>
    %c0_2 = arith.constant 0 : index
    %c0_3 = arith.constant 0 : index
    %4 = vector.load %arg3[%c0_2, %c0_3] : memref<16x128xf32, #tpu.memory_space<vmem>>, vector<16x128xf32>
    %5 = arith.subf %3, %4 : vector<16x128xf32>
    %6 = math.absf %5 : vector<16x128xf32>
    %cst = arith.constant -2.000000e+00 : f32
    %7 = vector.broadcast %cst : f32 to vector<16x128xf32>
    %8 = arith.mulf %7, %6 : vector<16x128xf32>
    %9 = math.exp %8 : vector<16x128xf32>
    %10 = math.log1p %9 : vector<16x128xf32>
    %11 = arith.addf %6, %10 : vector<16x128xf32>
    %cst_4 = arith.constant 0.693147182 : f32
    %12 = vector.broadcast %cst_4 : f32 to vector<16x128xf32>
    %13 = arith.subf %11, %12 : vector<16x128xf32>
    %14 = vector.shape_cast %13 : vector<16x128xf32> to vector<2x8x128xf32>
    %cst_5 = arith.constant dense<0.000000e+00> : vector<8x128xf32>
    %15 = vector.multi_reduction <add>, %14, %cst_5 [0] : vector<2x8x128xf32> to vector<8x128xf32>
    %c0_6 = arith.constant 0 : index
    %c0_7 = arith.constant 0 : index
    %c0_8 = arith.constant 0 : index
    %16 = vector.load %arg4[%c0_6, %c0_7, %c0_8] : memref<1x8x128xf32, #tpu.memory_space<vmem>>, vector<1x8x128xf32>
    %17 = vector.shape_cast %15 : vector<8x128xf32> to vector<1x8x128xf32>
    %18 = arith.addf %16, %17 : vector<1x8x128xf32>
    %c0_9 = arith.constant 0 : index
    %c0_10 = arith.constant 0 : index
    %c0_11 = arith.constant 0 : index
    %19 = vector.load %arg4[%c0_9, %c0_10, %c0_11] : memref<1x8x128xf32, #tpu.memory_space<vmem>>, vector<1x8x128xf32>
    tpu.vector_store %arg4[%c0_9, %c0_10, %c0_11], %18 {strides = array<i32>} : memref<1x8x128xf32, #tpu.memory_space<vmem>>, vector<1x8x128xf32>,
    return
  }
  func.func @transform_0(%arg0: i32, %arg1: i32) -> (i32, i32) {
    %c1_i32 = arith.constant 1 : i32
    %0 = arith.muli %arg0, %c1_i32 : i32
    %1 = arith.addi %0, %arg1 : i32
    %c0_i32 = arith.constant 0 : i32
    %2 = arith.minsi %1, %c0_i32 : i32
    %c0_i32_0 = arith.constant 0 : i32
    %c0_i32_1 = arith.constant 0 : i32
    return %2, %c0_i32_0 : i32, i32
  }
  func.func @transform_1(%arg0: i32, %arg1: i32) -> (i32, i32) {
    %c1_i32 = arith.constant 1 : i32
    %0 = arith.muli %arg0, %c1_i32 : i32
    %1 = arith.addi %0, %arg1 : i32
    %c0_i32 = arith.constant 0 : i32
    %2 = arith.minsi %1, %c0_i32 : i32
    %c0_i32_0 = arith.constant 0 : i32
    %c0_i32_1 = arith.constant 0 : i32
    return %2, %c0_i32_0 : i32, i32
  }
  func.func @transform_2(%arg0: i32, %arg1: i32) -> (i32, i32, i32) {
    %c0_i32 = arith.constant 0 : i32
    %c0_i32_0 = arith.constant 0 : i32
    %c0_i32_1 = arith.constant 0 : i32
    return %arg0, %c0_i32, %c0_i32_0 : i32, i32, i32
  }
}

</mosaic_0001>

<bundles_post_ra>
// kernel: tpu_custom_call.1
= control target key start
LH: loop header
LB: loop body
LE: loop exit
PB: predicated region body
PF: predicated region fallthrough
CT: control target
= control target key end

     0   :  { %7 = vsyncpa [#allocation3], 0  ;;  %s236_s0 = inlined_call_operand.hbm [shape: f32[16,128], index: 0, kind: input, shape index: {}]   ;;  %s237_s1 = inlined_call_operand.hbm [shape: f32[16,128], index: 1, kind: input, shape index: {}]   ;;  %s238_s2 = inlined_call_operand.hbm [shape: f32[1,8,128], index: 2, kind: output, shape index: {}]  }
   0x1   :  { %8 = vsyncpa [#allocation6], 0 }
   0x2   :  { %9 = vsyncpa [#allocation4], 0  ;;  %s207_s9 = smov [#allocation2]  }
   0x3   :  { %s21_s10 = sshll.u32 %s207_s9, 4  ;;  %s22_s10 = int_to_ptr.vmem [resolvable:$true] %s21_s10 }
   0x4   :  { %s149_s11 = scalar_lea.vmem %s22_s10, 256  ;;  %p154_p1 = scmp.lt.s32.totalorder %s22_s10, %s22_s10 }
   0x5   :  { %p150_p0 = scmp.ne.s32.totalorder %s22_s10, %s149_s11  ;;  %p155_p2 = scmp.lt.s32.totalorder %s149_s11, %s149_s11 }
   0x7   :  { %p156_p3 = por %p155_p2, %p154_p1 }
   0x9   :  { %p157_p4 = pnand %p156_p3, %p150_p0 }
   0xb   :  { %160 = shalt.err (!%p157_p4)
}
   0xc   :  { %s208_s12 = smov 128   ;;  %s209_s13 = smov 8  }
   0xd   :  { %27 = dma.hbm_to_vmem [thread:$0]  %s236_s0, 256, %s22_s10, [#allocation3], %s208_s12, %s208_s12, %s209_s13  }
   0xe   :  { %s210_s16 = smov [#allocation5]  }
   0xf   :  { %s39_s17 = sshll.u32 %s210_s16, 4  ;;  %s40_s17 = int_to_ptr.vmem [resolvable:$true] %s39_s17 }
  0x10   :  { %s169_s18 = scalar_lea.vmem %s40_s17, 256  ;;  %p174_p6 = scmp.lt.s32.totalorder %s40_s17, %s40_s17 }
  0x11   :  { %p170_p5 = scmp.ne.s32.totalorder %s40_s17, %s169_s18  ;;  %p175_p7 = scmp.lt.s32.totalorder %s169_s18, %s169_s18 }
  0x13   :  { %p176_p8 = por %p175_p7, %p174_p6 }
  0x15   :  { %p177_p9 = pnand %p176_p8, %p170_p5 }
  0x17   :  { %180 = shalt.err (!%p177_p9)
}
  0x18   :  { %45 = dma.hbm_to_vmem [thread:$0]  %s237_s1, 256, %s40_s17, [#allocation6], %s208_s12, %s208_s12, %s209_s13  }
  0x19   :  { %201 = dma.done.wait [#allocation3], 256  }
  0x1a   :  { %202 = vsyncadd [#allocation3], 4294967040 }
  0x1b   :  { %203 = dma.done.wait [#allocation6], 256  }
  0x1c   :  { %204 = vsyncadd [#allocation6], 4294967040  ;;  %v65_v0 = vld [vmem:[#allocation2] sm:$0xff]  ;;  %v66_v1 = vld [vmem:[#allocation2 + $0x8] sm:$0xff]  ;;  %s211_s0 = smov [#allocation7]  }
  0x1d   :  { %v67_v2 = vld [vmem:[#allocation5] sm:$0xff]  ;;  %v68_v3 = vld [vmem:[#allocation5 + $0x8] sm:$0xff]  ;;  %s111_s1 = sshll.u32 %s211_s0, 4  ;;  %s112_s1 = int_to_ptr.vmem [resolvable:$true] %s111_s1 }
  0x1e   :  { %v69_v4 = vsub.f32 %v65_v0, %v67_v2  ;;  %v70_v5 = vsub.f32 %v66_v1, %v68_v3  ;;  %s181_s21 = scalar_lea.vmem %s112_s1, 128  ;;  %p186_p11 = scmp.lt.s32.totalorder %s112_s1, %s112_s1 }
  0x1f   :  { %p182_p10 = scmp.ne.s32.totalorder %s112_s1, %s181_s21  ;;  %p187_p12 = scmp.lt.s32.totalorder %s181_s21, %s181_s21 }
  0x20   :  { %v71_v6 = vand.u32 2147483647, %v69_v4  ;;  %v72_v7 = vand.u32 2147483647, %v70_v5 }
  0x21   :  { %p188_p13 = por %p187_p12, %p186_p11 }
  0x22   :  { %v73_v8 = vmul.f32 -2.0, %v71_v6  ;;  %v74_v9 = vmul.f32 -2.0, %v72_v7 }
  0x23   :  { %p189_p0 = pnand %p188_p13, %p182_p10 }
  0x24   :  { %v75_v10 = vmul.f32 1.442695, %v73_v8  ;;  %v77_v11 = vmul.f32 1.442695, %v74_v9 }
  0x26   :  { %133 = vpow2.f32 %v75_v10 }
  0x27   :  { %135 = vpow2.f32 %v77_v11 }
  0x33   :  { %v134_v12 = vpop.eup %133 }
  0x34   :  { %v136_v13 = vpop.eup %135  ;;  %v79_v14 = vadd.f32 1.0, %v134_v12  ;;  %v82_v16 = vmul.f32 -0.5, %v134_v12  ;;  %v85_v19 = vand.u32 2147483647, %v134_v12 }
  0x35   :  { %v88_v15 = vadd.f32 1.0, %v136_v13  ;;  %v91_v17 = vmul.f32 -0.5, %v136_v13  ;;  %v94_v21 = vand.u32 2147483647, %v136_v13 }
  0x36   :  { %137 = vlog2.f32 %v79_v14  ;;  %v83_v18 = vadd.f32 1.0, %v82_v16  ;;  %vm86_vm0 = vcmp.lt.f32.partialorder %v85_v19, 0.0004427343 }
  0x37   :  { %139 = vlog2.f32 %v88_v15  ;;  %v92_v20 = vadd.f32 1.0, %v91_v17  ;;  %vm95_vm1 = vcmp.lt.f32.partialorder %v94_v21, 0.0004427343 }
  0x38   :  { %v84_v22 = vmul.f32 %v134_v12, %v83_v18 }
  0x39   :  { %v93_v24 = vmul.f32 %v136_v13, %v92_v20 }
  0x43   :  { %v138_v23 = vpop.eup %137 }
  0x44   :  { %v140_v25 = vpop.eup %139  ;;  %v81_v26 = vmul.f32 0.6931472, %v138_v23 }
  0x45   :  { %v90_v27 = vmul.f32 0.6931472, %v140_v25 }
  0x46   :  { %v87_v28 = vsel %vm86_vm0, %v84_v22, %v81_v26 }
  0x47   :  { %v96_v29 = vsel %vm95_vm1, %v93_v24, %v90_v27  ;;  %v97_v30 = vadd.f32 %v87_v28, %v71_v6 }
  0x48   :  { %v98_v31 = vadd.f32 %v96_v29, %v72_v7 }
  0x49   :  { %v125_v32 = vadd.f32 -0.6931472, %v97_v30 }
  0x4a   :  { %v126_v33 = vadd.f32 -0.6931472, %v98_v31 }
  0x4c   :  { %v101_v34 = vadd.f32 %v126_v33, %v125_v32 }
  0x4e   :  { %104 = vst [vmem:[#allocation7] sm:$0xff] %v101_v34 }
  0x4f   :  { %192 = shalt.err (!%p189_p0)
}
  0x50   :  { %114 = dma.vmem_to_hbm [thread:$0]  %s112_s1, 128, %s238_s2, [#allocation4]  }
  0x51   :  { %205 = dma.done.wait [#allocation4], 128  }
  0x52   :  { %206 = vsyncadd [#allocation4], 4294967168 }
  0x53   :  { %118 = vsyncpa [#allocation3], 1 }
  0x54   :  { %119 = vsyncpa [#allocation6], 1 }
  0x55   :  { %120 = vsyncpa [#allocation4], 1 }

</bundles_post_ra>
